<compile_context>
chip_gen: v5e
topology: v5e:2x2
jax: 0.10.0
libtpu: 0.0.40
codegen_flags: <defaults>
</compile_context>

<pallas_src>
import functools

import jax
import jax.numpy as jnp
from jax.experimental import pallas as pl
from jax.experimental.pallas import tpu as pltpu

_LN_EPS = 1e-5  # nn.LayerNorm default


def _round_up(v, m):
    return ((v + m - 1) // m) * m


def _pick_tile_m(M, tile_m):
    # Multiple of 8 (f32 sublane); bounded by requested tile size.
    return max(8, min(_round_up(tile_m, 8), _round_up(M, 8)))


# ----------------------------------------------------------------------------
# Standalone LayerNorm kernel (generic PreNorm path)
# ----------------------------------------------------------------------------
def _layer_norm_kernel(x_ref, g_ref, b_ref, o_ref):
    x = x_ref[...].astype(jnp.float32)                    # (TM, dim)
    mu = jnp.mean(x, axis=-1, keepdims=True)
    xc = x - mu
    var = jnp.mean(xc * xc, axis=-1, keepdims=True)       # unbiased=False (PyTorch)
    inv = jax.lax.rsqrt(var + _LN_EPS)
    y = xc * inv * g_ref[...] + b_ref[...]
    o_ref[...] = y.astype(o_ref.dtype)


def layer_norm(x, gamma, beta, *, tile_m=256):
    """x: (B, N, dim).  gamma/beta: (1, dim) f32.  Returns (B, N, dim)."""
    B, N, dim = x.shape
    M = B * N
    x2d = x.reshape(M, dim)
    TM = _pick_tile_m(M, tile_m)

    out2d = pl.pallas_call(
        _layer_norm_kernel,
        out_shape=jax.ShapeDtypeStruct((M, dim), x.dtype),
        grid_spec=pltpu.PrefetchScalarGridSpec(
            num_scalar_prefetch=0,
            grid=(pl.cdiv(M, TM),),
            in_specs=[
                pl.BlockSpec((TM, dim), lambda i: (i, 0)),   # x tile
                pl.BlockSpec((1, dim), lambda i: (0, 0)),    # gamma (resident)
                pl.BlockSpec((1, dim), lambda i: (0, 0)),    # beta  (resident)
            ],
            out_specs=pl.BlockSpec((TM, dim), lambda i: (i, 0)),
        ),
        compiler_params=pltpu.CompilerParams(
            dimension_semantics=("parallel",)),
    )(x2d, gamma, beta)
    return out2d.reshape(B, N, dim)


def pre_norm(x, gamma, beta, fn, **kwargs):
    """Generic PreNorm: fn(LayerNorm(x), **kwargs), with LayerNorm in Pallas."""
    return fn(layer_norm(x, gamma, beta), **kwargs)


# ----------------------------------------------------------------------------
# Fused PreNorm + FeedForward kernel (fn = Linear -> GELU -> Linear)
# ----------------------------------------------------------------------------
def _prenorm_ffn_kernel(x_ref, g_ref, be_ref, w1_ref, b1_ref, w2_ref, b2_ref,
                        o_ref):
    # x_ref: (TM, dim) f32 ; g/be: (1, dim) f32 ; w1: (dim, hidden) bf16 ;
    # b1: (1, hidden) f32 ; w2: (hidden, dim) bf16 ; b2: (1, dim) f32.
    x = x_ref[...].astype(jnp.float32)
    # --- LayerNorm (f32) ---
    mu = jnp.mean(x, axis=-1, keepdims=True)
    xc = x - mu
    var = jnp.mean(xc * xc, axis=-1, keepdims=True)
    inv = jax.lax.rsqrt(var + _LN_EPS)
    xn = xc * inv * g_ref[...] + be_ref[...]
    # --- Linear 1 (bf16 MXU, f32 acc) + exact GELU (PyTorch default) ---
    h = jnp.dot(xn.astype(w1_ref.dtype), w1_ref[...],
                preferred_element_type=jnp.float32) + b1_ref[...]
    h = jax.nn.gelu(h, approximate=False)
    # Dropout(p=0.0) is identity -> omitted.
    # --- Linear 2 (bf16 MXU, f32 acc) ---
    out = jnp.dot(h.astype(w2_ref.dtype), w2_ref[...],
                  preferred_element_type=jnp.float32) + b2_ref[...]
    o_ref[...] = out.astype(o_ref.dtype)


def pre_norm_feed_forward(x, gamma, beta, w1, b1, w2, b2, *, tile_m=256):
    """Fused PreNorm(dim, FeedForward(dim, hidden)).  x: (B, N, dim) f32."""
    B, N, dim = x.shape
    hidden = w1.shape[1]
    M = B * N
    x2d = x.reshape(M, dim)
    TM = _pick_tile_m(M, tile_m)

    bytes_accessed = (
        x2d.size * x2d.dtype.itemsize
        + sum(int(a.size) * a.dtype.itemsize for a in (gamma, beta, w1, b1, w2, b2))
        + M * dim * x.dtype.itemsize)
    cost = pl.CostEstimate(
        flops=4 * M * dim * hidden,          # two matmuls, 2*M*K*N each
        transcendentals=M * hidden,          # erf in GELU
        bytes_accessed=bytes_accessed)

    out2d = pl.pallas_call(
        _prenorm_ffn_kernel,
        out_shape=jax.ShapeDtypeStruct((M, dim), x.dtype),
        grid_spec=pltpu.PrefetchScalarGridSpec(
            num_scalar_prefetch=0,
            grid=(pl.cdiv(M, TM),),
            in_specs=[
                pl.BlockSpec((TM, dim), lambda i: (i, 0)),      # x tile (pipelined)
                pl.BlockSpec((1, dim), lambda i: (0, 0)),       # gamma  (resident)
                pl.BlockSpec((1, dim), lambda i: (0, 0)),       # beta   (resident)
                pl.BlockSpec((dim, hidden), lambda i: (0, 0)),  # w1     (resident)
                pl.BlockSpec((1, hidden), lambda i: (0, 0)),    # b1     (resident)
                pl.BlockSpec((hidden, dim), lambda i: (0, 0)),  # w2     (resident)
                pl.BlockSpec((1, dim), lambda i: (0, 0)),       # b2     (resident)
            ],
            out_specs=pl.BlockSpec((TM, dim), lambda i: (i, 0)),
        ),
        compiler_params=pltpu.CompilerParams(
            dimension_semantics=("parallel",)),   # megacore on v7x
        cost_estimate=cost,
    )(x2d, gamma, beta, w1, b1, w2, b2)
    # TODO(synk): for very large `hidden` add a second "arbitrary" grid axis over
    # hidden with a VMEM f32 accumulator instead of shrinking TM.
    return out2d.reshape(B, N, dim)


# ----------------------------------------------------------------------------
# Parameter init (mirrors PyTorch defaults: LayerNorm gamma=1/beta=0, Linear
# uniform(-1/sqrt(fan_in), 1/sqrt(fan_in))).  Weights stored (in, out), bf16.
# ----------------------------------------------------------------------------
def init_params(key, dim, hidden_dim):
    k1, k2, k3, k4 = jax.random.split(key, 4)
    lim1 = 1.0 / jnp.sqrt(dim)
    lim2 = 1.0 / jnp.sqrt(hidden_dim)
    gamma = jnp.ones((1, dim), jnp.float32)
    beta = jnp.zeros((1, dim), jnp.float32)
    w1 = jax.random.uniform(k1, (dim, hidden_dim), jnp.float32, -lim1, lim1)
    b1 = jax.random.uniform(k2, (1, hidden_dim), jnp.float32, -lim1, lim1)
    w2 = jax.random.uniform(k3, (hidden_dim, dim), jnp.float32, -lim2, lim2)
    b2 = jax.random.uniform(k4, (1, dim), jnp.float32, -lim2, lim2)
    return gamma, beta, w1.astype(jnp.bfloat16), b1, w2.astype(jnp.bfloat16), b2


def _layer_norm_ref(x, gamma, beta):
    mu = jnp.mean(x, axis=-1, keepdims=True)
    var = jnp.mean((x - mu) ** 2, axis=-1, keepdims=True)
    return (x - mu) * jax.lax.rsqrt(var + _LN_EPS) * gamma + beta


if __name__ == "__main__":
    key = jax.random.PRNGKey(0)
    # Small but lane-aligned shapes (dim/hidden multiples of 128).
    B, N, dim, hidden = 2, 8, 128, 256
    kx, kp = jax.random.split(key)
    x = jax.random.normal(kx, (B, N, dim), jnp.float32)
    gamma, beta, w1, b1, w2, b2 = init_params(kp, dim, hidden)

    # 1) Standalone LayerNorm kernel (generic PreNorm path).
    y_ln = jax.block_until_ready(layer_norm(x, gamma, beta))
    ref_ln = _layer_norm_ref(x, gamma, beta)
    assert y_ln.shape == (B, N, dim)
    assert jnp.allclose(y_ln, ref_ln, atol=1e-5, rtol=1e-5)

    # 2) Fused PreNorm + FeedForward kernel.
    y = jax.block_until_ready(
        pre_norm_feed_forward(x, gamma, beta, w1, b1, w2, b2))

    # Pure-JAX reference with matching precision (bf16 matmuls, f32 accumulation).
    xn = ref_ln.reshape(-1, dim)
    h = jnp.dot(xn.astype(jnp.bfloat16), w1,
                preferred_element_type=jnp.float32) + b1
    h = jax.nn.gelu(h, approximate=False)
    ref = jnp.dot(h.astype(jnp.bfloat16), w2,
                  preferred_element_type=jnp.float32) + b2
    ref = ref.reshape(B, N, dim)

    assert y.shape == (B, N, dim)
    assert jnp.allclose(y, ref, atol=2e-2, rtol=2e-2)

    # 3) Generic PreNorm wrapper (Pallas LayerNorm -> arbitrary fn).
    ffn_fn = lambda z: (jnp.dot(
        z.reshape(-1, dim).astype(jnp.bfloat16), w1,
        preferred_element_type=jnp.float32) + b1)
    _ = jax.block_until_ready(pre_norm(x, gamma, beta, ffn_fn))

    print("KERNEL_OK")
</pallas_src>

<mosaic_0001>
module attributes {stable_mosaic.version = 11 : i64} {
  func.func @_layer_norm_kernel(%arg0: i32, %arg1: memref<16x128xf32, #tpu.memory_space<vmem>>, %arg2: memref<1x128xf32, #tpu.memory_space<vmem>>, %arg3: memref<1x128xf32, #tpu.memory_space<vmem>>, %arg4: memref<16x128xf32, #tpu.memory_space<vmem>>) attributes {dimension_semantics = [#tpu.dimension_semantics<parallel>], iteration_bounds = array<i64: 1>, scalar_prefetch = 0 : i64, scratch_operands = 0 : i64, tpu.core_type = #tpu.core_type<tc>, window_params = [{transform_indices = @transform_0, window_bounds = array<i64: 16, 128>}, {pipeline_mode = #tpu.pipeline_mode<synchronous>, transform_indices = @transform_1, window_bounds = array<i64: 1, 128>}, {pipeline_mode = #tpu.pipeline_mode<synchronous>, transform_indices = @transform_2, window_bounds = array<i64: 1, 128>}, {transform_indices = @transform_3, window_bounds = array<i64: 16, 128>}]} {
    %c0 = arith.constant 0 : index
    %c0_0 = arith.constant 0 : index
    %0 = vector.load %arg1[%c0, %c0_0] : memref<16x128xf32, #tpu.memory_space<vmem>>, vector<16x128xf32>
    %cst = arith.constant dense<0.000000e+00> : vector<16xf32>
    %1 = vector.multi_reduction <add>, %0, %cst [1] : vector<16x128xf32> to vector<16xf32>
    %2 = vector.shape_cast %1 : vector<16xf32> to vector<16x1xf32>
    %cst_1 = arith.constant 1.280000e+02 : f32
    %3 = vector.broadcast %cst_1 : f32 to vector<16x1xf32>
    %4 = arith.divf %2, %3 : vector<16x1xf32>
    %5 = vector.broadcast %4 : vector<16x1xf32> to vector<16x128xf32>
    %6 = arith.subf %0, %5 : vector<16x128xf32>
    %7 = arith.mulf %6, %6 : vector<16x128xf32>
    %cst_2 = arith.constant dense<0.000000e+00> : vector<16xf32>
    %8 = vector.multi_reduction <add>, %7, %cst_2 [1] : vector<16x128xf32> to vector<16xf32>
    %9 = vector.shape_cast %8 : vector<16xf32> to vector<16x1xf32>
    %cst_3 = arith.constant 1.280000e+02 : f32
    %10 = vector.broadcast %cst_3 : f32 to vector<16x1xf32>
    %11 = arith.divf %9, %10 : vector<16x1xf32>
    %cst_4 = arith.constant 9.99999974E-6 : f32
    %12 = vector.broadcast %cst_4 : f32 to vector<16x1xf32>
    %13 = arith.addf %11, %12 : vector<16x1xf32>
    %14 = math.rsqrt %13 : vector<16x1xf32>
    %15 = vector.broadcast %14 : vector<16x1xf32> to vector<16x128xf32>
    %16 = arith.mulf %6, %15 : vector<16x128xf32>
    %c0_5 = arith.constant 0 : index
    %c0_6 = arith.constant 0 : index
    %17 = vector.load %arg2[%c0_5, %c0_6] : memref<1x128xf32, #tpu.memory_space<vmem>>, vector<1x128xf32>
    %18 = vector.broadcast %17 : vector<1x128xf32> to vector<16x128xf32>
    %19 = arith.mulf %16, %18 : vector<16x128xf32>
    %c0_7 = arith.constant 0 : index
    %c0_8 = arith.constant 0 : index
    %20 = vector.load %arg3[%c0_7, %c0_8] : memref<1x128xf32, #tpu.memory_space<vmem>>, vector<1x128xf32>
    %21 = vector.broadcast %20 : vector<1x128xf32> to vector<16x128xf32>
    %22 = arith.addf %19, %21 : vector<16x128xf32>
    %c0_9 = arith.constant 0 : index
    %c0_10 = arith.constant 0 : index
    %23 = vector.load %arg4[%c0_9, %c0_10] : memref<16x128xf32, #tpu.memory_space<vmem>>, vector<16x128xf32>
    tpu.vector_store %arg4[%c0_9, %c0_10], %22 {strides = array<i32>} : memref<16x128xf32, #tpu.memory_space<vmem>>, vector<16x128xf32>,
    return
  }
  func.func @transform_0(%arg0: i32) -> (i32, i32) {
    %c0_i32 = arith.constant 0 : i32
    %c0_i32_0 = arith.constant 0 : i32
    return %arg0, %c0_i32 : i32, i32
  }
  func.func @transform_1(%arg0: i32) -> (i32, i32) {
    %c0_i32 = arith.constant 0 : i32
    %c0_i32_0 = arith.constant 0 : i32
    %c0_i32_1 = arith.constant 0 : i32
    return %c0_i32, %c0_i32_0 : i32, i32
  }
  func.func @transform_2(%arg0: i32) -> (i32, i32) {
    %c0_i32 = arith.constant 0 : i32
    %c0_i32_0 = arith.constant 0 : i32
    %c0_i32_1 = arith.constant 0 : i32
    return %c0_i32, %c0_i32_0 : i32, i32
  }
  func.func @transform_3(%arg0: i32) -> (i32, i32) {
    %c0_i32 = arith.constant 0 : i32
    %c0_i32_0 = arith.constant 0 : i32
    return %arg0, %c0_i32 : i32, i32
  }
}

</mosaic_0001>

<bundles_post_ra>
// kernel: tpu_custom_call.1
= control target key start
LH: loop header
LB: loop body
LE: loop exit
PB: predicated region body
PF: predicated region fallthrough
CT: control target
= control target key end

     0   :  { %8 = vsyncpa [#allocation3], 0  ;;  %s264_s0 = inlined_call_operand.hbm [shape: f32[16,128], index: 0, kind: input, shape index: {}]   ;;  %s265_s1 = inlined_call_operand.hbm [shape: f32[1,128], index: 1, kind: input, shape index: {}]   ;;  %s266_s2 = inlined_call_operand.vmem [shape: f32[1,128], index: 2, kind: input, shape index: {}]   ;;  %s267_s3 = inlined_call_operand.hbm [shape: f32[16,128], index: 3, kind: output, shape index: {}]  }
   0x1   :  { %9 = vsyncpa [#allocation6], 0 }
   0x2   :  { %10 = vsyncpa [#allocation4], 0  ;;  %s15_s14 = sshll.u32 %s264_s0, 4  ;;  %s220_s15 = smov [#allocation2]   ;;  %s16_s14 = int_to_ptr.hbm [resolvable:$true] %s15_s14 }
   0x3   :  { %s17_s16 = sshll.u32 %s220_s15, 4  ;;  %s29_s19 = sshll.u32 %s265_s1, 4  ;;  %s18_s16 = int_to_ptr.vmem [resolvable:$true] %s17_s16  ;;  %s30_s19 = int_to_ptr.hbm [resolvable:$true] %s29_s19 }
   0x4   :  { %s221_s20 = smov 128   ;;  %s222_s21 = smov 8  }
   0x5   :  { %23 = dma.hbm_to_vmem [thread:$0]  %s16_s14, 256, %s18_s16, [#allocation3], %s221_s20, %s221_s20, %s222_s21  }
   0x6   :  { %s223_s22 = smov [#allocation5]  }
   0x7   :  { %s31_s23 = sshll.u32 %s223_s22, 4  ;;  %s32_s23 = int_to_ptr.vmem [resolvable:$true] %s31_s23 }
   0x8   :  { %34 = dma.hbm_to_vmem [thread:$0]  %s30_s19, 16, %s32_s23, [#allocation6]  }
   0x9   :  { %214 = dma.done.wait [#allocation3], 256  }
   0xa   :  { %215 = vsyncadd [#allocation3], 4294967040 }
   0xb   :  { %216 = dma.done.wait [#allocation6], 16  }
   0xc   :  { %217 = vsyncadd [#allocation6], 4294967280  ;;  %v45_v0 = vld [vmem:[#allocation2] sm:$0xff]  ;;  %v46_v1 = vld [vmem:[#allocation2 + $0x8] sm:$0xff]  ;;  %v224_v2 = vmov 128.0   ;;  %s225_s24 = smov [#allocation7]  }
   0xd   :  { %47 = vadd.xlane.f32.xlu0 %v45_v0  ;;  %136 = vrcp.f32 %v224_v2  ;;  %v134_v31 = vld [vmem:[#allocation5] ss:$0 sm:$0xff]  ;;  %v135_v35 = vld [vmem:[%s266_s2] ss:$0 sm:$0xff]  ;;  %s112_s25 = sshll.u32 %s225_s24, 4  ;;  %s114_s28 = sshll.u32 %s267_s3, 4  ;;  %s113_s25 = int_to_ptr.vmem [resolvable:$true] %s112_s25  ;;  %s115_s28 = int_to_ptr.hbm [resolvable:$true] %s114_s28 }
  0x13   :  { %v137_v3 = vpop.eup %136 }
  0x14   :  { %v52_v4 = vmul.f32 128.0, %v137_v3  ;;  %vm56_vm0 = vweird.f32 %v137_v3 }
  0x15   :  { %49 = vadd.xlane.f32.xlu0 %v46_v1 }
  0x16   :  { %v53_v5 = vsub.f32 1.0, %v52_v4 }
  0x18   :  { %v54_v6 = vmul.f32 %v137_v3, %v53_v5 }
  0x1a   :  { %v55_v7 = vadd.f32 %v137_v3, %v54_v6 }
  0x1c   :  { %v57_v8 = vsel %vm56_vm0, %v137_v3, %v55_v7 }
  0x80   :  { %v48_v9 = vpop.xlane.xlu0 %47 }
  0x81   :  { %v58_v10 = vmul.f32 %v57_v8, %v48_v9 }
  0x83   :  { %v60_v11 = vsub.f32 %v45_v0, %v58_v10 }
  0x85   :  { %v62_v12 = vmul.f32 %v60_v11, %v60_v11 }
  0x87   :  { %64 = vadd.xlane.f32.xlu1 %v62_v12 }
  0x88   :  { %v50_v13 = vpop.xlane.xlu0 %49 }
  0x89   :  { %v59_v14 = vmul.f32 %v57_v8, %v50_v13 }
  0x8b   :  { %v61_v15 = vsub.f32 %v46_v1, %v59_v14 }
  0x8d   :  { %v63_v16 = vmul.f32 %v61_v15, %v61_v15 }
  0x8f   :  { %66 = vadd.xlane.f32.xlu1 %v63_v16 }
  0xfa   :  { %v65_v17 = vpop.xlane.xlu1 %64 }
  0xfb   :  { %v68_v18 = vmul.f32 %v65_v17, %v57_v8 }
  0xfd   :  { %v70_v19 = vadd.f32 1e-05, %v68_v18 }
  0xff   :  { %138 = vrsqrt.f32 %v70_v19  ;;  %vm78_vm2 = vweird.f32 %v70_v19 }
 0x102   :  { %v67_v20 = vpop.xlane.xlu1 %66 }
 0x103   :  { %v69_v21 = vmul.f32 %v67_v20, %v57_v8 }
 0x105   :  { %v139_v22 = vpop.eup %138  ;;  %v71_v23 = vadd.f32 1e-05, %v69_v21 }
 0x106   :  { %v73_v24 = vmul.f32 %v139_v22, %v70_v19  ;;  %vm79_vm1 = vweird.f32 %v139_v22 }
 0x107   :  { %140 = vrsqrt.f32 %v71_v23  ;;  %vm80_vm3 = vmor %vm78_vm2, %vm79_vm1  ;;  %vm88_vm5 = vweird.f32 %v71_v23 }
 0x108   :  { %v74_v25 = vmul.f32 %v139_v22, %v73_v24 }
 0x10a   :  { %v75_v26 = vmul.f32 0.5, %v74_v25 }
 0x10c   :  { %v76_v27 = vsub.f32 1.5, %v75_v26 }
 0x10d   :  { %v141_v28 = vpop.eup %140 }
 0x10e   :  { %v77_v29 = vmul.f32 %v139_v22, %v76_v27  ;;  %v83_v30 = vmul.f32 %v141_v28, %v71_v23  ;;  %vm89_vm4 = vweird.f32 %v141_v28 }
 0x10f   :  { %vm90_vm6 = vmor %vm88_vm5, %vm89_vm4 }
 0x110   :  { %v81_v32 = vsel %vm80_vm3, %v139_v22, %v77_v29  ;;  %v84_v33 = vmul.f32 %v141_v28, %v83_v30 }
 0x111   :  { %v92_v34 = vmul.f32 %v81_v32, %v60_v11 }
 0x112   :  { %v85_v36 = vmul.f32 0.5, %v84_v33 }
 0x113   :  { %v98_v37 = vmul.f32 %v134_v31, %v92_v34 }
 0x114   :  { %v86_v38 = vsub.f32 1.5, %v85_v36 }
 0x115   :  { %v104_v39 = vadd.f32 %v135_v35, %v98_v37 }
 0x116   :  { %v87_v40 = vmul.f32 %v141_v28, %v86_v38 }
 0x117   :  { %106 = vst [vmem:[#allocation7] sm:$0xff] %v104_v39 }
 0x118   :  { %v91_v41 = vsel %vm90_vm6, %v141_v28, %v87_v40 }
 0x119   :  { %v93_v42 = vmul.f32 %v91_v41, %v61_v15 }
 0x11b   :  { %v99_v43 = vmul.f32 %v134_v31, %v93_v42 }
 0x11d   :  { %v105_v44 = vadd.f32 %v135_v35, %v99_v43 }
 0x11f   :  { %107 = vst [vmem:[#allocation7 + $0x8] sm:$0xff] %v105_v44 }
 0x120   :  { %120 = dma.vmem_to_hbm [thread:$0]  %s113_s25, 256, %s115_s28, [#allocation4], %s221_s20, %s221_s20, %s222_s21  }
 0x121   :  { %218 = dma.done.wait [#allocation4], 256  }
 0x122   :  { %219 = vsyncadd [#allocation4], 4294967040 }
 0x123   :  { %125 = vsyncpa [#allocation3], 1 }
 0x124   :  { %126 = vsyncpa [#allocation6], 1 }
 0x125   :  { %127 = vsyncpa [#allocation4], 1 }

</bundles_post_ra>
